<compile_context>
chip_gen: v6e
topology: v6e:2x2x1
jax: 0.10.0
libtpu: 0.0.40
codegen_flags: <defaults>
</compile_context>

<pallas_src>
import math

import jax
import jax.numpy as jnp
from jax.experimental import pallas as pl
from jax.experimental.pallas import tpu as pltpu  # noqa: F401  (TPU backend)


def fused_mlp_sub_kernel(x_ref, wb_ref, other_ref, out_ref):
    # wb_ref packs [W ; b] as rows: W = wb[:in_f, :], b = wb[in_f:, :].
    in_f = wb_ref.shape[0] - 1
    x = x_ref[...]                                   # (B, in_f)
    w = wb_ref[0:in_f, :]                            # (in_f, out_f) static slice
    b = wb_ref[in_f:in_f + 1, :]                     # (1, out_f)    static slice
    y = jnp.dot(x, w, preferred_element_type=jnp.float32) + b
    out_ref[...] = (y - other_ref[...]).astype(out_ref.dtype)


def fuse_params(w1, b1, w2, b2):
    """One-time algebraic fusion of fc2(fc1(.)) into a single affine map.

    y = (x @ w1.T + b1) @ w2.T + b2 = x @ (w2 @ w1).T + (b1 @ w2.T + b2)
    Returns a single packed (in_features + 1, out_features) buffer [W ; b].
    """
    w_fused = (w2 @ w1).T                            # (10, 9)
    b_fused = b1 @ w2.T + b2                         # (9,)
    return jnp.concatenate([w_fused, b_fused[None, :]], axis=0)  # (11, 9)


def model_forward(x, other, wb_packed):
    """y = fc2(fc1(x)) - other as one Pallas TPU kernel (single matmul)."""
    B = x.shape[0]
    out_features = wb_packed.shape[1]

    full = lambda shape: pl.BlockSpec(shape, lambda: (0,) * len(shape))

    return pl.pallas_call(
        fused_mlp_sub_kernel,
        out_shape=jax.ShapeDtypeStruct((B, out_features), jnp.float32),
        grid=(),
        in_specs=[
            full(x.shape),
            full(wb_packed.shape),
            full(other.shape),
        ],
        out_specs=full((B, out_features)),
    )(x, wb_packed, other)


def init_linear_params(key, in_features, out_features):
    """Deterministic PyTorch-style Linear init: U(-1/sqrt(in), 1/sqrt(in))."""
    kw, kb = jax.random.split(key)
    bound = 1.0 / math.sqrt(in_features)
    w = jax.random.uniform(kw, (out_features, in_features),
                           minval=-bound, maxval=bound, dtype=jnp.float32)
    b = jax.random.uniform(kb, (out_features,),
                           minval=-bound, maxval=bound, dtype=jnp.float32)
    return w, b


if __name__ == "__main__":
    root = jax.random.PRNGKey(0)
    k_x, k_other, k_fc1, k_fc2 = jax.random.split(root, 4)

    # Shapes implied by the module: x (4, 10), other (4, 9)
    x = jax.random.normal(k_x, (4, 10), dtype=jnp.float32)
    other = jax.random.normal(k_other, (4, 9), dtype=jnp.float32)

    w1, b1 = init_linear_params(k_fc1, 10, 16)       # fc1: Linear(10, 16)
    w2, b2 = init_linear_params(k_fc2, 16, 9)        # fc2: Linear(16, 9)

    # Fuse + pack the parameters once (would be cached across calls in a
    # real serving loop), then run the single-matmul kernel.
    wb = fuse_params(w1, b1, w2, b2)                 # (11, 9)
    y = model_forward(x, other, wb)
    jax.block_until_ready(y)

    # Reference check against the unfused two-linear computation.
    y_ref = (x @ w1.T + b1) @ w2.T + b2 - other
    assert y.shape == (4, 9)
    assert jnp.allclose(y, y_ref, atol=1e-4, rtol=1e-4)

    print("KERNEL_OK")
</pallas_src>

<mosaic_0001>
module attributes {stable_mosaic.version = 11 : i64} {
  func.func @fused_mlp_sub_kernel(%arg0: memref<4x10xf32, #tpu.memory_space<vmem>>, %arg1: memref<11x9xf32, #tpu.memory_space<vmem>>, %arg2: memref<4x9xf32, #tpu.memory_space<vmem>>, %arg3: memref<4x9xf32, #tpu.memory_space<vmem>>) attributes {dimension_semantics = [], scalar_prefetch = 0 : i64, scratch_operands = 0 : i64, tpu.core_type = #tpu.core_type<tc>} {
    %c0 = arith.constant 0 : index
    %c0_0 = arith.constant 0 : index
    %0 = vector.load %arg0[%c0, %c0_0] : memref<4x10xf32, #tpu.memory_space<vmem>>, vector<4x10xf32>
    %c0_1 = arith.constant 0 : index
    %c0_2 = arith.constant 0 : index
    %1 = vector.load %arg1[%c0_1, %c0_2] : memref<11x9xf32, #tpu.memory_space<vmem>>, vector<10x9xf32>
    %c10 = arith.constant 10 : index
    %c0_3 = arith.constant 0 : index
    %2 = vector.load %arg1[%c10, %c0_3] : memref<11x9xf32, #tpu.memory_space<vmem>>, vector<1x9xf32>
    %cst = arith.constant dense<0.000000e+00> : vector<4x9xf32>
    %3 = tpu.matmul %0, %1, %cst {dimension_numbers = #tpu.dot_dimension_numbers<[1], [0], [0], [1], [0, 0, 1, 1], [], []>} : vector<4x10xf32>, vector<10x9xf32>, vector<4x9xf32> -> vector<4x9xf32>
    %4 = vector.broadcast %2 : vector<1x9xf32> to vector<4x9xf32>
    %5 = arith.addf %3, %4 : vector<4x9xf32>
    %c0_4 = arith.constant 0 : index
    %c0_5 = arith.constant 0 : index
    %6 = vector.load %arg2[%c0_4, %c0_5] : memref<4x9xf32, #tpu.memory_space<vmem>>, vector<4x9xf32>
    %7 = arith.subf %5, %6 : vector<4x9xf32>
    %c0_6 = arith.constant 0 : index
    %c0_7 = arith.constant 0 : index
    %8 = vector.load %arg3[%c0_6, %c0_7] : memref<4x9xf32, #tpu.memory_space<vmem>>, vector<4x9xf32>
    tpu.vector_store %arg3[%c0_6, %c0_7], %7 {strides = array<i32>} : memref<4x9xf32, #tpu.memory_space<vmem>>, vector<4x9xf32>,
    return
  }
}

</mosaic_0001>

<bundles_post_ra>
// kernel: tpu_custom_call.1
= control target key start
LH: loop header
LB: loop body
LE: loop exit
PB: predicated region body
PF: predicated region fallthrough
CT: control target
= control target key end

     0   :  { %8 = vsyncpa [#allocation3], 0  ;;  %s305_s0 = inlined_call_operand.hbm [shape: f32[4,10], index: 0, kind: input, shape index: {}]   ;;  %s306_s1 = inlined_call_operand.hbm [shape: f32[11,9], index: 1, kind: input, shape index: {}]   ;;  %s307_s2 = inlined_call_operand.hbm [shape: f32[4,9], index: 2, kind: input, shape index: {}]   ;;  %s308_s3 = inlined_call_operand.hbm [shape: f32[4,9], index: 3, kind: output, shape index: {}]  }
   0x1   :  { %9 = vsyncpa [#allocation6], 0 }
   0x2   :  { %10 = vsyncpa [#allocation4], 0  ;;  %s265_s12 = smov [#allocation5]  }
   0x3   :  { %s26_s13 = sshll.u32 %s265_s12, 4  ;;  %s27_s13 = int_to_ptr.vmem [resolvable:$true] %s26_s13 }
   0x4   :  { %s187_s14 = scalar_lea.vmem %s27_s13, 256  ;;  %p192_p1 = scmp.lt.s32.totalorder %s27_s13, %s27_s13 }
   0x5   :  { %p188_p0 = scmp.ne.s32.totalorder %s27_s13, %s187_s14  ;;  %p193_p2 = scmp.lt.s32.totalorder %s187_s14, %s187_s14 }
   0x7   :  { %p194_p3 = por %p193_p2, %p192_p1 }
   0x9   :  { %p195_p4 = pnand %p194_p3, %p188_p0 }
   0xb   :  { %198 = shalt.err (!%p195_p4)
}
   0xc   :  { %s266_s15 = smov 128   ;;  %s267_s16 = smov 8  }
   0xd   :  { %32 = dma.hbm_to_vmem [thread:$0]  %s306_s1, 256, %s27_s13, [#allocation6], %s266_s15, %s266_s15, %s267_s16  }
   0xe   :  { %s268_s19 = smov [#allocation2]   ;;  %s269_s21 = smov [#allocation7]  }
   0xf   :  { %s17_s20 = sshll.u32 %s268_s19, 4  ;;  %s39_s22 = sshll.u32 %s269_s21, 4  ;;  %s18_s20 = int_to_ptr.vmem [resolvable:$true] %s17_s20  ;;  %s40_s22 = int_to_ptr.vmem [resolvable:$true] %s39_s22 }
  0x10   :  { %s207_s23 = scalar_lea.vmem %s18_s20, 64  ;;  %p212_p6 = scmp.lt.s32.totalorder %s18_s20, %s18_s20 }
  0x11   :  { %p208_p5 = scmp.ne.s32.totalorder %s18_s20, %s207_s23  ;;  %p213_p7 = scmp.lt.s32.totalorder %s207_s23, %s207_s23 }
  0x13   :  { %p214_p8 = por %p213_p7, %p212_p6 }
  0x15   :  { %p215_p9 = pnand %p214_p8, %p208_p5 }
  0x17   :  { %218 = shalt.err (!%p215_p9)
}
  0x18   :  { %20 = dma.hbm_to_vmem [thread:$0]  %s305_s0, 64, %s18_s20, [#allocation3]  }
  0x19   :  { %s227_s26 = scalar_lea.vmem %s40_s22, 64  ;;  %p232_p11 = scmp.lt.s32.totalorder %s40_s22, %s40_s22 }
  0x1a   :  { %p228_p10 = scmp.ne.s32.totalorder %s40_s22, %s227_s26  ;;  %p233_p12 = scmp.lt.s32.totalorder %s227_s26, %s227_s26 }
  0x1c   :  { %p234_p13 = por %p233_p12, %p232_p11 }
  0x1e   :  { %p235_p0 = pnand %p234_p13, %p228_p10 }
  0x20   :  { %238 = shalt.err (!%p235_p0)
}
  0x21   :  { %42 = dma.hbm_to_vmem [thread:$0]  %s307_s2, 64, %s40_s22, [#allocation6]  }
  0x22   :  { %259 = dma.done.wait [#allocation3], 64  }
  0x23   :  { %260 = vsyncadd [#allocation3], 4294967232 }
  0x24   :  { %261 = dma.done.wait [#allocation6], 320  }
  0x25   :  { %262 = vsyncadd [#allocation6], 4294966976  ;;  %v270_v0 = vmov 0.0   ;;  %vm271_vm0 = vmmov 0   ;;  %vm64_vm1 = vcmask 1041408   ;;  %v53_v2 = vld [vmem:[#allocation5] sm:$0xff] }
  0x26   :  { %164 = vmatprep.subr.mxu0 %v270_v0  ;;  %168 = vmatprep.mubr.msk.f32.mxu0 %vm271_vm0, %v270_v0  ;;  %v54_v1 = vld [vmem:[#allocation5 + $0x8] sm:$0x3]  ;;  %v52_v3 = vld [vmem:[#allocation2] sm:$0xf]  ;;  %vm60_vm2 = vcmask 80896   ;;  %s272_s0 = smov [#allocation8]  }
  0x27   :  { %165 = vmatpush3.msk.msra.mxu0 %vm64_vm1, %v54_v1  ;;  %v158_v4 = vld [vmem:[#allocation5 + $0xa] ss:$0 sm:$0xff]  ;;  %v138_v6 = vld [vmem:[#allocation7] sm:$0xf]  ;;  %s148_s2 = sshll.u32 %s272_s0, 4  ;;  %vm140_vm3 = vcmask 68608   ;;  %s149_s2 = int_to_ptr.vmem [resolvable:$true] %s148_s2 }
  0x28   :  { %166 = vmatprep.subr.mxu0 %v270_v0  ;;  %s239_s28 = scalar_lea.vmem %s149_s2, 64  ;;  %p244_p2 = scmp.lt.s32.totalorder %s149_s2, %s149_s2 }
  0x29   :  { %167 = vmatpush3.msra.mxu0 %v53_v2  ;;  %p240_p1 = scmp.ne.s32.totalorder %s149_s2, %s239_s28  ;;  %p245_p3 = scmp.lt.s32.totalorder %s239_s28, %s239_s28 }
  0x2a   :  { %169 = vmatmul.mubr.msk.f32.vlgmr.msra.gmra.mxu0 %vm60_vm2, %v52_v3 }
  0x2b   :  { %p246_p4 = por %p245_p3, %p244_p2 }
  0x2d   :  { %p247_p5 = pnand %p246_p4, %p240_p1 }
  0xea   :  { %v134_v5 = vpop.f32.mrf.mxu0 }
  0xeb   :  { %v135_v7 = vadd.f32 %v158_v4, %v134_v5 }
  0xec   :  { %v170_v8 = vpop.f32.mrf.mxu0 }
  0xed   :  { %v139_v9 = vsub.f32 %v135_v7, %v138_v6 }
  0xef   :  { %141 = vst.msk [vmem:[#allocation8] sm:$0xf] %vm140_vm3, %v139_v9 }
  0xf0   :  { %250 = shalt.err (!%p247_p5)
}
  0xf1   :  { %151 = dma.vmem_to_hbm [thread:$0]  %s149_s2, 64, %s308_s3, [#allocation4]  }
  0xf2   :  { %263 = dma.done.wait [#allocation4], 64  }
  0xf3   :  { %264 = vsyncadd [#allocation4], 4294967232 }
  0xf4   :  { %155 = vsyncpa [#allocation3], 1 }
  0xf5   :  { %156 = vsyncpa [#allocation6], 1 }
  0xf6   :  { %157 = vsyncpa [#allocation4], 1 }

</bundles_post_ra>
